<compile_context>
chip_gen: v6e
topology: v6e:2x2x1
jax: 0.10.0
libtpu: 0.0.40
codegen_flags: <defaults>
</compile_context>

<pallas_src>
import functools

import jax
import jax.numpy as jnp
import numpy as np
from jax import lax
from jax.experimental import pallas as pl
from jax.experimental.pallas import tpu as pltpu


def _dn4_kernel(q_ref, s_ref, g_ref, o_ref, *,
                n_classes, n_chunks, chunk_w, m_real, neighbor_k):
    # q_ref: (1, R, C)                 raw query descriptors (f32), R = TB*P
    # s_ref: (N*n_chunks, C, chunk_w)  pre-normalized support chunks (bf16)
    # g_ref: (TB, R)                   0/1 row->image grouping matrix (f32)
    # o_ref: (1, TB, N)                per-class similarity scores (f32)
    q = q_ref[0]                                            # (R, C) f32
    r = q.shape[0]
    g = g_ref[...]                                          # (TB, R) f32
    tb = g.shape[0]
    neg = jnp.float32(-jnp.inf)
    mask_pad = (n_chunks * chunk_w) > m_real                # static python bool

    # Row L2 normalization (rsqrt -> EUP).  All-zero rows give NaN, like torch.
    inv = lax.rsqrt(jnp.sum(q * q, axis=-1, keepdims=True))
    qn = (q * inv).astype(jnp.bfloat16)                     # (R, C) bf16

    def class_body(j, scores):
        # ---- streaming top-k over this class's lane chunks ----------------
        def chunk_body(c, regs):
            s_blk = s_ref[j * n_chunks + c]                 # (C, chunk_w) bf16
            sim = jnp.dot(qn, s_blk,
                          preferred_element_type=jnp.float32)   # (R, chunk_w)
            if mask_pad:
                lane = lax.broadcasted_iota(jnp.int32, sim.shape, 1)
                sim = jnp.where(c * chunk_w + lane < m_real, sim, neg)

            # chunk-local top-k by iterative extraction (ties: all equal
            # elements masked at once -> differs from torch.topk only on
            # exact float ties).
            cur = sim
            cvals = []
            for t in range(neighbor_k):
                m = jnp.max(cur, axis=-1, keepdims=True)    # (R, 1)
                cvals.append(m)
                if t + 1 < neighbor_k:
                    cur = jnp.where(cur == m, neg, cur)

            # merge chunk top-k into running registers:
            #   kth(A ∪ B) = max_{i+j=k} min(A_i, B_j), A_0 = B_0 = +inf
            new_regs = []
            for kk in range(1, neighbor_k + 1):
                t = cvals[kk - 1]                           # i = 0 term
                t = jnp.maximum(t, regs[kk - 1])            # j = 0 term
                for i in range(1, kk):
                    t = jnp.maximum(
                        t, jnp.minimum(regs[i - 1], cvals[kk - i - 1]))
                new_regs.append(t)
            return tuple(new_regs)

        init = tuple(jnp.full((r, 1), neg, jnp.float32)
                     for _ in range(neighbor_k))
        regs = lax.fori_loop(0, n_chunks, chunk_body, init)

        tot = regs[0]
        for t in range(1, neighbor_k):
            tot = tot + regs[t]                             # (R, 1) sum of top-k

        # Per-image sum over the P descriptor rows via a tiny group matmul.
        per_img = jnp.dot(g, tot,
                          preferred_element_type=jnp.float32)   # (TB, 1)

        # Scatter per_img into column j of the (TB, N) carry (iota select).
        col = lax.broadcasted_iota(jnp.int32, scores.shape, 1)
        return scores + jnp.where(col == j, per_img, 0.0)

    scores0 = jnp.zeros((tb, n_classes), jnp.float32)
    scores = lax.fori_loop(0, n_classes, class_body, scores0)
    o_ref[0] = scores


def img_to_class_metric(x1, x2_stacked, neighbor_k=3, tb=None):
    """x1: (B, C, h, w) queries (NCHW). x2_stacked: (N, C, M) support classes.

    Returns the (B, N) similarity matrix of ImgtoClass_Metric.forward.
    """
    B, C, h, w = x1.shape
    N, C2, M = x2_stacked.shape
    assert C == C2
    assert neighbor_k <= M, "torch.topk would fail for neighbor_k > M"
    P = h * w
    m_pad = ((M + 127) // 128) * 128

    # ---- query tiling: TB images per grid step --------------------------
    # Keep >= 2 grid steps when B >= 2 (megacore "parallel" axis) while
    # amortizing the ~0.35us/step pipeline overhead on bigger batches.
    if tb is None:
        tb = max(1, min(8, -(-B // 2)))
    b_pad = -(-B // tb) * tb
    n_blocks = b_pad // tb
    r = tb * P

    # ---- class-chunk width: largest 128-multiple divisor of m_pad keeping
    # the f32 sim chunk bounded (~6 MiB), so (R, N*M_pad) never materializes.
    budget = 6 * 1024 * 1024
    chunk_w = 128
    c = 128
    while c <= m_pad:
        if (m_pad % c == 0) and (r * c * 4 <= budget):
            chunk_w = c
        c += 128
    n_ch = m_pad // chunk_w

    # ---- one-time wrapper-side support prep (XLA) ------------------------
    s = x2_stacked.astype(jnp.float32)
    s = s / jnp.linalg.norm(s, axis=1, keepdims=True)        # cols L2-normalized
    s = jnp.pad(s, ((0, 0), (0, 0), (0, m_pad - M)))         # (N, C, m_pad)
    s = s.reshape(N, C, n_ch, chunk_w).transpose(0, 2, 1, 3)
    s = s.reshape(N * n_ch, C, chunk_w).astype(jnp.bfloat16)

    # ---- query prep: NCHW -> (n_blocks, R, C) descriptor rows ------------
    q = jnp.transpose(x1.reshape(B, C, P), (0, 2, 1)).astype(jnp.float32)
    if b_pad != B:
        # Pad with ones (NOT zeros): all-zero rows would produce NaNs.
        q = jnp.concatenate([q, jnp.ones((b_pad - B, P, C), q.dtype)], axis=0)
    q = q.reshape(n_blocks, r, C)

    # 0/1 grouping matrix: G[t, row] = 1 iff row belongs to local image t.
    g = (jnp.arange(r)[None, :] // P == jnp.arange(tb)[:, None])
    g = g.astype(jnp.float32)                                # (TB, R)

    # ---- chip-aware VMEM limit from the post-chunking footprint ----------
    q_bytes = r * C * 4
    s_bytes = int(np.prod(s.shape)) * 2
    g_bytes = tb * r * 4
    sim_bytes = r * chunk_w * 4
    out_bytes = tb * N * 4
    footprint = (2 * q_bytes            # double-buffered query block
                 + 2 * s_bytes          # resident support chunks (2 bufs worst case)
                 + 2 * g_bytes + 2 * out_bytes
                 + 3 * sim_bytes        # sim chunk + extraction temporaries
                 + 2 * q_bytes          # qn f32 + bf16 copy
                 + (neighbor_k + 1) * r * 4)
    try:
        vmem_cap = pltpu.get_tpu_info().vmem_capacity_bytes
    except Exception:
        vmem_cap = 64 * 1024 * 1024
    vmem_limit = int(min(max(2 * footprint, 16 * 1024 * 1024),
                         (2 * vmem_cap) // 5))

    out = pl.pallas_call(
        functools.partial(_dn4_kernel, n_classes=N, n_chunks=n_ch,
                          chunk_w=chunk_w, m_real=M, neighbor_k=neighbor_k),
        out_shape=jax.ShapeDtypeStruct((n_blocks, tb, N), jnp.float32),
        grid_spec=pltpu.PrefetchScalarGridSpec(
            num_scalar_prefetch=0,
            grid=(n_blocks,),
            in_specs=[
                pl.BlockSpec((1, r, C), lambda i: (i, 0, 0)),
                pl.BlockSpec((N * n_ch, C, chunk_w), lambda i: (0, 0, 0)),
                pl.BlockSpec((tb, r), lambda i: (0, 0)),
            ],
            out_specs=pl.BlockSpec((1, tb, N), lambda i: (i, 0, 0)),
        ),
        compiler_params=pltpu.CompilerParams(
            dimension_semantics=("parallel",),
            vmem_limit_bytes=vmem_limit),
    )(q, s, g)
    return out.reshape(b_pad, N)[:B]


def _reference(x1, x2_stacked, neighbor_k=3):
    """Pure-JAX (f32) reference mirroring the PyTorch loop structure."""
    B, C, h, w = x1.shape
    rows = []
    for i in range(B):
        qs = x1[i].reshape(C, -1).T                         # (h*w, C)
        qs = qs / jnp.linalg.norm(qs, axis=1, keepdims=True)
        vals = []
        for j in range(x2_stacked.shape[0]):
            ss = x2_stacked[j]
            ss = ss / jnp.linalg.norm(ss, axis=0, keepdims=True)
            ip = qs @ ss                                    # (h*w, M)
            topv, _ = jax.lax.top_k(ip, neighbor_k)
            vals.append(jnp.sum(topv))
        rows.append(jnp.stack(vals))
    return jnp.stack(rows)


if __name__ == "__main__":
    key = jax.random.PRNGKey(0)
    k1, k2 = jax.random.split(key)

    B, C, h, w = 2, 32, 5, 5          # query images (NCHW)
    N_CLASSES = 4                     # number of support classes
    SHOTS = 3
    M = SHOTS * h * w                 # local descriptors per class
    NEIGHBOR_K = 3

    x1 = jax.random.normal(k1, (B, C, h, w), dtype=jnp.float32)
    x2 = jax.random.normal(k2, (N_CLASSES, C, M), dtype=jnp.float32)

    out = jax.block_until_ready(img_to_class_metric(x1, x2,
                                                    neighbor_k=NEIGHBOR_K))
    ref = jax.block_until_ready(_reference(x1, x2, NEIGHBOR_K))

    # Tolerance relaxed from 1e-5: the kernel uses bf16 matmul inputs with
    # f32 accumulation; the f32 reference differs by ~1e-3..1e-2.
    np.testing.assert_allclose(np.asarray(out), np.asarray(ref),
                               rtol=2e-2, atol=2e-2)

    print("KERNEL_OK")
</pallas_src>

<mosaic_0001>
module attributes {stable_mosaic.version = 11 : i64} {
  func.func @_dn4_kernel(%arg0: i32, %arg1: memref<1x25x32xf32, #tpu.memory_space<vmem>>, %arg2: memref<4x32x128xbf16, #tpu.memory_space<vmem>>, %arg3: memref<1x25xf32, #tpu.memory_space<vmem>>, %arg4: memref<1x1x4xf32, #tpu.memory_space<vmem>>) attributes {dimension_semantics = [#tpu.dimension_semantics<parallel>], iteration_bounds = array<i64: 2>, scalar_prefetch = 0 : i64, scratch_operands = 0 : i64, tpu.core_type = #tpu.core_type<tc>, window_params = [{transform_indices = @transform_0, window_bounds = array<i64: 1, 25, 32>}, {pipeline_mode = #tpu.pipeline_mode<synchronous>, transform_indices = @transform_1, window_bounds = array<i64: 4, 32, 128>}, {pipeline_mode = #tpu.pipeline_mode<synchronous>, transform_indices = @transform_2, window_bounds = array<i64: 1, 25>}, {transform_indices = @transform_3, window_bounds = array<i64: 1, 1, 4>}]} {
    %c0 = arith.constant 0 : index
    %c0_0 = arith.constant 0 : index
    %c0_1 = arith.constant 0 : index
    %0 = vector.load %arg1[%c0, %c0_0, %c0_1] : memref<1x25x32xf32, #tpu.memory_space<vmem>>, vector<1x25x32xf32>
    %1 = vector.shape_cast %0 : vector<1x25x32xf32> to vector<25x32xf32>
    %c0_2 = arith.constant 0 : index
    %c0_3 = arith.constant 0 : index
    %2 = vector.load %arg3[%c0_2, %c0_3] : memref<1x25xf32, #tpu.memory_space<vmem>>, vector<1x25xf32>
    %3 = arith.mulf %1, %1 : vector<25x32xf32>
    %cst = arith.constant dense<0.000000e+00> : vector<25xf32>
    %4 = vector.multi_reduction <add>, %3, %cst [1] : vector<25x32xf32> to vector<25xf32>
    %5 = vector.shape_cast %4 : vector<25xf32> to vector<25x1xf32>
    %6 = math.rsqrt %5 : vector<25x1xf32>
    %7 = vector.broadcast %6 : vector<25x1xf32> to vector<25x32xf32>
    %8 = arith.mulf %1, %7 : vector<25x32xf32>
    %9 = arith.truncf %8 : vector<25x32xf32> to vector<25x32xbf16>
    %cst_4 = arith.constant 0.000000e+00 : f32
    %10 = vector.broadcast %cst_4 : f32 to vector<1x4xf32>
    %cst_5 = arith.constant 0xFF800000 : f32
    %c0_i32 = arith.constant 0 : i32
    %c4_i32 = arith.constant 4 : i32
    %11 = arith.addi %c0_i32, %c4_i32 : i32
    %c1_i32 = arith.constant 1 : i32
    %12 = scf.for %arg5 = %c0_i32 to %11 step %c1_i32 iter_args(%arg6 = %10) -> (vector<1x4xf32>)  : i32 {
      %16 = vector.broadcast %cst_5 : f32 to vector<25x1xf32>
      %17 = vector.broadcast %cst_5 : f32 to vector<25x1xf32>
      %18 = vector.broadcast %cst_5 : f32 to vector<25x1xf32>
      %c0_i32_10 = arith.constant 0 : i32
      %c1_i32_11 = arith.constant 1 : i32
      %19 = arith.muli %arg5, %c1_i32_11 : i32
      %20 = arith.addi %19, %c0_i32_10 : i32
      %21 = arith.index_cast %20 : i32 to index
      %c0_12 = arith.constant 0 : index
      %c0_13 = arith.constant 0 : index
      %22 = vector.load %arg2[%21, %c0_12, %c0_13] : memref<4x32x128xbf16, #tpu.memory_space<vmem>>, vector<1x32x128xbf16>
      %23 = vector.shape_cast %22 : vector<1x32x128xbf16> to vector<32x128xbf16>
      %cst_14 = arith.constant dense<0.000000e+00> : vector<25x128xf32>
      %24 = tpu.matmul %9, %23, %cst_14 {dimension_numbers = #tpu.dot_dimension_numbers<[1], [0], [0], [1], [0, 0, 1, 1], [], []>} : vector<25x32xbf16>, vector<32x128xbf16>, vector<25x128xf32> -> vector<25x128xf32>
      %25 = tpu.iota {dimensions = array<i32: 1>} : vector<25x128xi32>
      %c128_i32 = arith.constant 128 : i32
      %26 = arith.muli %c0_i32_10, %c128_i32 : i32
      %27 = vector.broadcast %26 : i32 to vector<25x128xi32>
      %28 = arith.addi %27, %25 : vector<25x128xi32>
      %c75_i32 = arith.constant 75 : i32
      %29 = vector.broadcast %c75_i32 : i32 to vector<25x128xi32>
      %30 = arith.cmpi slt, %28, %29 : vector<25x128xi32>
      %31 = vector.broadcast %cst_5 : f32 to vector<25x128xf32>
      %32 = arith.select %30, %24, %31 : vector<25x128xi1>, vector<25x128xf32>
      %cst_15 = arith.constant dense<0xFF800000> : vector<25xf32>
      %33 = vector.multi_reduction <maximumf>, %32, %cst_15 [1] : vector<25x128xf32> to vector<25xf32>
      %34 = vector.shape_cast %33 : vector<25xf32> to vector<25x1xf32>
      %35 = vector.broadcast %34 : vector<25x1xf32> to vector<25x128xf32>
      %36 = arith.cmpf oeq, %32, %35 : vector<25x128xf32>
      %37 = vector.broadcast %cst_5 : f32 to vector<25x128xf32>
      %38 = arith.select %36, %37, %32 : vector<25x128xi1>, vector<25x128xf32>
      %cst_16 = arith.constant dense<0xFF800000> : vector<25xf32>
      %39 = vector.multi_reduction <maximumf>, %38, %cst_16 [1] : vector<25x128xf32> to vector<25xf32>
      %40 = vector.shape_cast %39 : vector<25xf32> to vector<25x1xf32>
      %41 = vector.broadcast %40 : vector<25x1xf32> to vector<25x128xf32>
      %42 = arith.cmpf oeq, %38, %41 : vector<25x128xf32>
      %43 = vector.broadcast %cst_5 : f32 to vector<25x128xf32>
      %44 = arith.select %42, %43, %38 : vector<25x128xi1>, vector<25x128xf32>
      %cst_17 = arith.constant dense<0xFF800000> : vector<25xf32>
      %45 = vector.multi_reduction <maximumf>, %44, %cst_17 [1] : vector<25x128xf32> to vector<25xf32>
      %46 = vector.shape_cast %45 : vector<25xf32> to vector<25x1xf32>
      %47 = arith.maximumf %34, %16 : vector<25x1xf32>
      %48 = arith.maximumf %40, %17 : vector<25x1xf32>
      %49 = arith.minimumf %16, %34 : vector<25x1xf32>
      %50 = arith.maximumf %48, %49 : vector<25x1xf32>
      %51 = arith.maximumf %46, %18 : vector<25x1xf32>
      %52 = arith.minimumf %16, %40 : vector<25x1xf32>
      %53 = arith.maximumf %51, %52 : vector<25x1xf32>
      %54 = arith.minimumf %17, %34 : vector<25x1xf32>
      %55 = arith.maximumf %53, %54 : vector<25x1xf32>
      %c1_i32_18 = arith.constant 1 : i32
      %56 = arith.addf %47, %50 : vector<25x1xf32>
      %57 = arith.addf %56, %55 : vector<25x1xf32>
      %cst_19 = arith.constant dense<0.000000e+00> : vector<1x1xf32>
      %58 = tpu.matmul %2, %57, %cst_19 {dimension_numbers = #tpu.dot_dimension_numbers<[1], [0], [0], [1], [0, 0, 1, 1], [], []>} : vector<1x25xf32>, vector<25x1xf32>, vector<1x1xf32> -> vector<1x1xf32>
      %59 = tpu.iota {dimensions = array<i32: 1>} : vector<1x4xi32>
      %60 = vector.broadcast %arg5 : i32 to vector<1x4xi32>
      %61 = arith.cmpi eq, %59, %60 : vector<1x4xi32>
      %cst_20 = arith.constant 0.000000e+00 : f32
      %62 = vector.shape_cast %58 : vector<1x1xf32> to vector<1x1xf32>
      %63 = vector.broadcast %62 : vector<1x1xf32> to vector<1x4xf32>
      %64 = vector.broadcast %cst_20 : f32 to vector<1x4xf32>
      %65 = arith.select %61, %63, %64 : vector<1x4xi1>, vector<1x4xf32>
      %66 = arith.addf %arg6, %65 : vector<1x4xf32>
      scf.yield %66 : vector<1x4xf32>
    }
    %c4_i32_6 = arith.constant 4 : i32
    %c0_7 = arith.constant 0 : index
    %c0_8 = arith.constant 0 : index
    %c0_9 = arith.constant 0 : index
    %13 = vector.load %arg4[%c0_7, %c0_8, %c0_9] : memref<1x1x4xf32, #tpu.memory_space<vmem>>, vector<1x1x4xf32>
    %14 = vector.shape_cast %13 : vector<1x1x4xf32> to vector<1x4xf32>
    %15 = vector.shape_cast %12 : vector<1x4xf32> to vector<1x1x4xf32>
    tpu.vector_store %arg4[%c0_7, %c0_8, %c0_9], %15 {strides = array<i32>} : memref<1x1x4xf32, #tpu.memory_space<vmem>>, vector<1x1x4xf32>,
    return
  }
  func.func @transform_0(%arg0: i32) -> (i32, i32, i32) {
    %c0_i32 = arith.constant 0 : i32
    %c0_i32_0 = arith.constant 0 : i32
    %c0_i32_1 = arith.constant 0 : i32
    return %arg0, %c0_i32, %c0_i32_0 : i32, i32, i32
  }
  func.func @transform_1(%arg0: i32) -> (i32, i32, i32) {
    %c0_i32 = arith.constant 0 : i32
    %c0_i32_0 = arith.constant 0 : i32
    %c0_i32_1 = arith.constant 0 : i32
    %c0_i32_2 = arith.constant 0 : i32
    return %c0_i32, %c0_i32_0, %c0_i32_1 : i32, i32, i32
  }
  func.func @transform_2(%arg0: i32) -> (i32, i32) {
    %c0_i32 = arith.constant 0 : i32
    %c0_i32_0 = arith.constant 0 : i32
    %c0_i32_1 = arith.constant 0 : i32
    return %c0_i32, %c0_i32_0 : i32, i32
  }
  func.func @transform_3(%arg0: i32) -> (i32, i32, i32) {
    %c0_i32 = arith.constant 0 : i32
    %c0_i32_0 = arith.constant 0 : i32
    %c0_i32_1 = arith.constant 0 : i32
    return %arg0, %c0_i32, %c0_i32_0 : i32, i32, i32
  }
}

</mosaic_0001>

<bundles_post_ra>
// kernel: tpu_custom_call.1
= control target key start
LH: loop header
LB: loop body
LE: loop exit
PB: predicated region body
PF: predicated region fallthrough
CT: control target
= control target key end

     0   :  { %8 = vsyncpa [#allocation3], 0  ;;  %s909_s0 = inlined_call_operand.vmem [shape: f32[2,25,32], index: 0, kind: input, shape index: {}]   ;;  %s910_s1 = inlined_call_operand.vmem [shape: bf16[4,32,128], index: 1, kind: input, shape index: {}]   ;;  %s911_s2 = inlined_call_operand.vmem [shape: f32[1,25], index: 2, kind: input, shape index: {}]   ;;  %s912_s3 = inlined_call_operand.hbm [shape: f32[2,1,4], index: 3, kind: output, shape index: {}]  }
   0x1   :  { %10 = vsyncpa [#allocation3 + $0x1], 0  ;;  %s746_s12 = smov 0   ;;  %s748_s13 = smov 0  }
   0x2   :  { %s750_s14 = smov 0   ;;  %s752_s15 = smov 0  }
   0x3 LB: > { %s767_s16 = sadd.s32 4294967295, %s712_s15   ;;  %s528_s17 = sadd.s32 4294967294, %s712_s15   ;;  %s712_s15 = sphi %s752_s15, %s919_s15   ;;  %s708_s14 = sphi %s750_s14, %s918_s14   ;;  %s704_s13 = sphi %s748_s13, %s917_s13   ;;  %s700_s12 = sphi %s746_s12, %s916_s12  }
   0x4   : > { %s771_s18 = sadd.s32 1, %s712_s15   ;;  %s91_s19 = sadd.s32 1, %s708_s14 }
   0x5   : > { %s88_s20 = ssub.s32 %s712_s15, %s771_s18  ;;  %p101_p0 = scmp.ne.s32.totalorder %s708_s14, %s704_s13 }
   0x6   : > { %p89_p1 = scmp.eq.s32.totalorder %s88_s20, 0  ;;  %p102_p2 = scmp.eq.s32.totalorder %s767_s16, 1 }
   0x7   : > { %p107_p3 = scmp.ne.s32.totalorder %s704_s13, %s700_s12  ;;  %p108_p4 = scmp.eq.s32.totalorder %s528_s17, 1 }
   0x8   : > { %s782_s21 = scalar_select %p89_p1, %s708_s14, %s91_s19  }
   0x9   : > { %p784_p5 = por %p102_p2, %p101_p0  ;;  %p788_p6 = por %p108_p4, %p107_p3 }
   0xa   : > { %p531_p7 = scmp.ge.s32.totalorder %s712_s15, 1  ;;  %p140_p8 = scmp.lt.s32.totalorder %s712_s15, 3 }
   0xc   : > { %p141_p9 = pnand %p531_p7, %p140_p8 }
   0xd   : > { %p163_p10 = scmp.lt.s32.totalorder (!%p141_p9), %s767_s16, 1  ;;  %s161_s29 = sand.u32 (!%p141_p9), 1, %s704_s13  }
   0xe   : > { %144 = sbr.rel (%p141_p9) target bundleno = 1163 (0x48b), region = 32  ;;  %s822_s5 = scalar_lea.vmem (!%p141_p9), [#allocation2], %s161_s29 }
   0xf   : > { %s826_s6 = smov (!%p141_p9), 0  }
  0x13   : > { %s164_s24 = scalar_select %p163_p10, %s767_s16, 1  ;;  %vm178_vm0 = vcmask 261120   ;;  %vm188_vm1 = vcmask 253952   ;;  %v806_v12 = vld [vmem:[%s911_s2] sm:$0x1]  ;;  %v824_v27 = vmov 0.0  }
  0x15   : > { %s545_s25 = sshll.u32 %s164_s24, 5 }
  0x16   : > { %s167_s28 = scalar_lea.vmem %s909_s0, %s545_s25 }
  0x17   : > { %v171_v0 = vld [vmem:[%s167_s28 + $0x10] sm:$0xff]  ;;  %v169_v1 = vld [vmem:[%s167_s28] sm:$0xff]  ;;  %v172_v2 = vld [vmem:[%s167_s28 + $0x18] sm:$0x1] }
  0x18   : > { %v176_v3 = vmul.f32 %v171_v0, %v171_v0  ;;  %v174_v4 = vmul.f32 %v169_v1, %v169_v1  ;;  %v177_v5 = vmul.f32 %v172_v2, %v172_v2  ;;  %v170_v6 = vld [vmem:[%s167_s28 + $0x8] sm:$0xff] }
  0x19   : > { %v175_v7 = vmul.f32 %v170_v6, %v170_v6 }
  0x1a   : > { %v185_v8 = vsel %vm178_vm0, %v176_v3, 0.0  ;;  %v179_v9 = vsel %vm178_vm0, %v174_v4, 0.0  ;;  %v189_v10 = vsel %vm188_vm1, %v177_v5, 0.0 }
  0x1b   : > { %186 = vadd.xlane.f32.xlu1 %v185_v8  ;;  %180 = vadd.xlane.f32.xlu0 %v179_v9  ;;  %v182_v11 = vsel %vm178_vm0, %v175_v7, 0.0 }
  0x1f   : > { %190 = vadd.xlane.f32.xlu1 %v189_v10  ;;  %183 = vadd.xlane.f32.xlu0 %v182_v11 }
  0xa4   : > { %v187_v13 = vpop.xlane.xlu1 %186  ;;  %v181_v14 = vpop.xlane.xlu0 %180 }
  0xa5   : > { %633 = vrsqrt.f32 %v187_v13 }
  0xa6   : > { %635 = vrsqrt.f32 %v181_v14 }
  0xa8   : > { %v191_v15 = vpop.xlane.xlu1 %190  ;;  %v184_v16 = vpop.xlane.xlu0 %183 }
  0xa9   : > { %637 = vrsqrt.f32 %v191_v15 }
  0xaa   : > { %639 = vrsqrt.f32 %v184_v16 }
  0xb2   : > { %v634_v17 = vpop.eup %633 }
  0xb3   : > { %v636_v18 = vpop.eup %635  ;;  %v808_v21 = vmul.f32 %v634_v17, %v171_v0 }
  0xb4   : > { %v812_v23 = vmul.f32 %v636_v18, %v169_v1 }
  0xb6   : > { %v638_v19 = vpop.eup %637 }
  0xb7   : > { %v640_v20 = vpop.eup %639  ;;  %v810_v22 = vmul.f32 %v638_v19, %v172_v2 }
  0xb8   : > { %v814_v24 = vmul.f32 %v640_v20, %v170_v6 }
  0xb9   : > { %v201_v25 = vpack.c.bf16 %v810_v22, %v808_v21 }
  0xba   : > { %v200_v26 = vpack.c.bf16 %v814_v24, %v812_v23 }
  0xbb LB: >> { %s546_s7 = sshll.u32 %s720_s6, 4  ;;  %v283_v30 = vlaneseq  ;;  %vm296_vm2 = vcmask 1040384   ;;  %v722_v59 = vmov 0.0   ;;  %vm723_vm12 = vmmov 0   ;;  %s720_s6 = sphi %s826_s6, %s207_s6   ;;  %v716_v27 = vphi %v824_v27, %v915_v27  }
  0xbc   : >> { %560 = vmatprep.mubr.msk.bf16.mxu0 %vm178_vm0, %v200_v26  ;;  %s211_s10 = scalar_lea.vmem %s910_s1, %s546_s7  ;;  %564 = vmatprep.subr.mxu1 %v722_v59  ;;  %v724_v60 = vmov 0   ;;  %vm362_vm13 = vcmask 203776  }
  0xbd   : >> { %v642_v28 = vld [vmem:[%s211_s10 + $0x8] sm:$0xff]   ;;  %v643_v29 = vld [vmem:[%s211_s10] sm:$0xff]   ;;  %v846_v32 = vand.u32 127, %v283_v30  ;;  %572 = vmatprep.mubr.msk.f32.mxu1 %vm723_vm12, %v722_v59  ;;  %641 = vset.pattern.permute.xlu0 %v724_v60 }
  0xbe   : >> { %556 = vmatprep.subr.bf16.mxu0 %v642_v28 }
  0xbf   : >> { %557 = vmatpush3.bf16.msra.mxu0 %v642_v28  ;;  %vm285_vm3 = vcmp.lt.s32.totalorder %v846_v32, 75 }
  0xc0   : >> { %558 = vmatprep.subr.bf16.mxu0 %v643_v29 }
  0xc3   : >> { %559 = vmatpush3.bf16.msra.mxu0 %v643_v29 }
  0xc6   : >> { %561 = vmatmul.mubr.msk.bf16.vlgmr.msra.gmra.mxu0 %vm178_vm0, %v201_v25 }
 0x186   : >> { %v562_v31 = vpop.f32.mrf.mxu0 }
 0x187   : >> { %v288_v39 = vsel %vm285_vm3, %v562_v31, -inf }
 0x188   : >> { %v268_v33 = vpop.f32.mrf.mxu0 }
 0x189   : >> { %v286_v40 = vsel %vm285_vm3, %v268_v33, -inf }
 0x18a   : >> { %v563_v34 = vpop.f32.mrf.mxu0 }
 0x18b   : >> { %v289_v35 = vsel %vm285_vm3, %v563_v34, -inf }
 0x18c   : >> { %v271_v36 = vpop.f32.mrf.mxu0  ;;  %v297_v37 = vsel %vm296_vm2, %v289_v35, -inf }
 0x18d   : >> { %v287_v38 = vsel %vm285_vm3, %v271_v36, -inf  ;;  %298 = vmax.xlane.f32.xlu0 %v297_v37 }
 0x18e   : >> { %292 = vmax.xlane.f32.xlu1 %v287_v38 }
 0x191   : >> { %294 = vmax.xlane.f32.xlu0 %v288_v39 }
 0x192   : >> { %290 = vmax.xlane.f32.xlu1 %v286_v40 }
 0x216   : >> { %v299_v41 = vpop.xlane.xlu0 %298 }
 0x217   : >> { %vm303_vm4 = vcmp.eq.f32.partialorder %v289_v35, %v299_v41  ;;  %v850_v42 = vpop.xlane.xlu1 %292  ;;  %v337_v61 = vmin.f32 %v299_v41, -inf }
 0x218   : >> { %v307_v43 = vsel %vm303_vm4, -inf, %v289_v35  ;;  %vm301_vm5 = vcmp.eq.f32.partialorder %v287_v38, %v850_v42  ;;  %v335_v3 = vmin.f32 %v850_v42, -inf }
 0x219   : >> { %v314_v44 = vsel %vm296_vm2, %v307_v43, -inf  ;;  %v305_v48 = vsel %vm301_vm5, -inf, %v287_v38 }
 0x21a   : >> { %315 = vmax.xlane.f32.xlu0 %v314_v44  ;;  %v295_v45 = vpop.xlane.xlu0 %294 }
 0x21b   : >> { %v854_v46 = vpop.xlane.xlu1 %290  ;;  %vm302_vm6 = vcmp.eq.f32.partialorder %v288_v39, %v295_v45  ;;  %v336_v62 = vmin.f32 %v295_v45, -inf }
 0x21c   : >> { %v306_v47 = vsel %vm302_vm6, -inf, %v288_v39  ;;  %vm300_vm7 = vcmp.eq.f32.partialorder %v286_v40, %v854_v46  ;;  %v334_v6 = vmin.f32 %v854_v46, -inf }
 0x21d   : >> { %312 = vmax.xlane.f32.xlu1 %v306_v47  ;;  %v304_v49 = vsel %vm300_vm7, -inf, %v286_v40  ;;  %v439_v40 = vstv %s720_s6  ;;  %s207_s6 = sadd.s32 1, %s720_s6  }
 0x21e   : >> { %310 = vmax.xlane.f32.xlu0 %v305_v48  ;;  %vm440_vm14 = vcmp.eq.s32.totalorder %v846_v32, %v439_v40  ;;  %p204_p11 = scmp.ge.s32.totalorder %s207_s6, 4  }
 0x21f   : > { %vm448_vm15 = vcmask (%p204_p11), 24576   ;;  %s542_s11 = sshll.u32 (%p204_p11), %s767_s16, 4  ;;  %s463_s24 = sshll.u32 (%p204_p11), %s822_s5, 4  ;;  %s464_s24 = int_to_ptr.vmem [resolvable:$true] %s463_s24 }
 0x220   : > { %s461_s20 = scalar_lea.hbm (%p204_p11), %s912_s3, %s542_s11  ;;  %s451_s25 = scalar_lea.sflag (%p204_p11), [#allocation3], %s161_s29 }
 0x221   : >> { %308 = vmax.xlane.f32.xlu1 %v304_v49  ;;  %s644_s26 = scalar_lea.vmem (%p204_p11), %s464_s24, 16  ;;  %s725_s27 = smov (%p204_p11), [#allocation2]  }
 0x222   : > { %p645_p12 = scmp.ne.s32.totalorder (%p204_p11), %s464_s24, %s644_s26  ;;  %s648_s28 = sshll.u32 (%p204_p11), %s725_s27, 4  ;;  %s649_s28 = int_to_ptr.vmem [resolvable:$false] %s648_s28 }
 0x223   : > { %s650_s30 = scalar_lea.vmem (%p204_p11), %s649_s28, 32  ;;  %p651_p1 = scmp.lt.s32.totalorder (%p204_p11), %s464_s24, %s649_s28 }
 0x224   : > { %p646_p13 = pnand (%p204_p11), %p645_p12, %p784_p5  ;;  %p652_p2 = scmp.lt.s32.totalorder (%p204_p11), %s650_s30, %s644_s26 }
 0x226   : > { %p647_p0 = pneg (%p204_p11), %p646_p13  ;;  %p653_p3 = por (%p204_p11), %p652_p2, %p651_p1 }
 0x228   : > { %p654_p4 = pnand (%p204_p11), %p653_p3, %p647_p0 }
 0x2a3   : >> { %v316_v50 = vpop.xlane.xlu0 %315 }
 0x2a4   : >> { %vm320_vm8 = vcmp.eq.f32.partialorder %v307_v43, %v316_v50  ;;  %v341_v63 = vmax.f32 %v316_v50, %v337_v61  ;;  %v345_v0 = vmin.f32 %v316_v50, -inf }
 0x2a5   : >> { %v324_v51 = vsel %vm320_vm8, -inf, %v307_v43 }
 0x2a6   : >> { %v313_v52 = vpop.xlane.xlu1 %312  ;;  %v331_v53 = vsel %vm296_vm2, %v324_v51, -inf  ;;  %v357_v7 = vadd.f32 %v341_v63, %v299_v41 }
 0x2a7   : >> { %332 = vmax.xlane.f32.xlu0 %v331_v53  ;;  %v311_v54 = vpop.xlane.xlu0 %310  ;;  %vm319_vm9 = vcmp.eq.f32.partialorder %v306_v47, %v313_v52  ;;  %v340_v1 = vmax.f32 %v313_v52, %v336_v62  ;;  %v344_v5 = vmin.f32 %v313_v52, -inf }
 0x2a8   : >> { %v323_v55 = vsel %vm319_vm9, -inf, %v306_v47  ;;  %vm318_vm10 = vcmp.eq.f32.partialorder %v305_v48, %v311_v54  ;;  %v339_v9 = vmax.f32 %v311_v54, %v335_v3  ;;  %v343_v13 = vmin.f32 %v311_v54, -inf }
 0x2a9   : >> { %329 = vmax.xlane.f32.xlu1 %v323_v55  ;;  %v322_v56 = vsel %vm318_vm10, -inf, %v305_v48  ;;  %v356_v14 = vadd.f32 %v340_v1, %v295_v45 }
 0x2aa   : >> { %v309_v57 = vpop.xlane.xlu1 %308  ;;  %v355_v29 = vadd.f32 %v339_v9, %v850_v42 }
 0x2ab   : >> { %327 = vmax.xlane.f32.xlu0 %v322_v56  ;;  %vm317_vm11 = vcmp.eq.f32.partialorder %v304_v49, %v309_v57  ;;  %v338_v15 = vmax.f32 %v309_v57, %v334_v6  ;;  %v342_v19 = vmin.f32 %v309_v57, -inf }
 0x2ac   : >> { %v321_v58 = vsel %vm317_vm11, -inf, %v304_v49 }
 0x2ad   : >> { %325 = vmax.xlane.f32.xlu1 %v321_v58  ;;  %v354_v34 = vadd.f32 %v338_v15, %v854_v46 }
 0x330   : >> { %v333_v2 = vpop.xlane.xlu0 %332 }
 0x331   : >> { %v349_v4 = vmax.f32 %v333_v2, %v345_v0 }
 0x332   : >> { %v330_v8 = vpop.xlane.xlu1 %329 }
 0x333   : >> { %v353_v10 = vmax.f32 %v349_v4, %v337_v61  ;;  %v348_v11 = vmax.f32 %v330_v8, %v344_v5 }
 0x334   : >> { %v328_v16 = vpop.xlane.xlu0 %327 }
 0x335   : >> { %v352_v17 = vmax.f32 %v348_v11, %v336_v62  ;;  %v347_v18 = vmax.f32 %v328_v16, %v343_v13  ;;  %v361_v20 = vadd.f32 %v357_v7, %v353_v10 }
 0x336   : >> { %v326_v28 = vpop.xlane.xlu1 %325 }
 0x337   : >> { %v351_v30 = vmax.f32 %v347_v18, %v335_v3  ;;  %v346_v31 = vmax.f32 %v326_v28, %v342_v19  ;;  %565 = vmatpush3.msk.msra.mxu1 %vm296_vm2, %v361_v20  ;;  %v360_v33 = vadd.f32 %v356_v14, %v352_v17 }
 0x338   : >> { %566 = vmatprep.subr.mxu1 %v722_v59 }
 0x339   : >> { %v350_v35 = vmax.f32 %v346_v31, %v334_v6  ;;  %567 = vmatpush3.msra.mxu1 %v360_v33  ;;  %v359_v36 = vadd.f32 %v355_v29, %v351_v30 }
 0x33a   : >> { %568 = vmatprep.subr.mxu1 %v722_v59 }
 0x33b   : >> { %569 = vmatpush3.msra.mxu1 %v359_v36  ;;  %v358_v37 = vadd.f32 %v354_v34, %v350_v35 }
 0x33c   : >> { %570 = vmatprep.subr.mxu1 %v722_v59 }
 0x33d   : >> { %571 = vmatpush3.msra.mxu1 %v358_v37 }
 0x33e   : >> { %573 = vmatmul.mubr.msk.f32.vlgmr.msra.gmra.mxu1 %vm362_vm13, %v806_v12 }
 0x3fe   : >> { %v435_v38 = vpop.f32.mrf.mxu1 }
 0x3ff   : >> { %443 = vperm.xlu0 %641, %v435_v38  }
 0x400   : >> { %v574_v39 = vpop.f32.mrf.mxu1 }
 0x47a   : >> { %v444_v41 = vpop.permute.xlu0 %443  ;;  %206 = sbr.rel (!%p204_p11) target bundleno = 187 (0xbb), region = 75 }
 0x47b   : >> { %v446_v42 = vsel %vm440_vm14, %v444_v41, 0.0 }
 0x47c   : >> { %v447_v43 = vadd.f32 %v716_v27, %v446_v42  }
 0x47e   : >> { %v915_v27 = vmov %v447_v43  ;;  %449 = vst.msk [vmem:[%s822_s5] sm:$0x1] (%p204_p11), %vm448_vm15, %v447_v43 }
 0x47f   : > { %657 = shalt.err (!%p654_p4)
}
 0x480   : > { %s658_s16 = scalar_lea.hbm %s461_s20, 16  ;;  %s662_s5 = scalar_lea.hbm %s912_s3, 32 }
 0x481   : > { %p659_p7 = scmp.ne.s32.totalorder %s461_s20, %s658_s16  ;;  %p663_p10 = scmp.lt.s32.totalorder %s461_s20, %s912_s3 }
 0x482   : > { %p664_p11 = scmp.lt.s32.totalorder %s662_s5, %s658_s16 }
 0x483   : > { %p660_p8 = pnand %p659_p7, %p784_p5 }
 0x484   : > { %p665_p12 = por %p664_p11, %p663_p10 }
 0x485   : > { %p661_p9 = pneg %p660_p8 }
 0x487   : > { %p666_p13 = pnand %p665_p12, %p661_p9 }
 0x489   : > { %669 = shalt.err (!%p666_p13)
}
 0x48a   : > { %575 = dma.vmem_to_hbm [thread:$0]  (%p784_p5), %s464_s24, 16, %s461_s20, %s451_s25  }
 0x48b PF: > { %p581_p0 = scmp.ge.s32.totalorder %s712_s15, 2  ;;  %s475_s8 = sand.u32 1, %s700_s12  }
 0x48c   : > { %s476_s9 = scalar_lea.sflag [#allocation3], %s475_s8 }
 0x48d   : > { %p578_p1 = pnand %p581_p0, %p788_p6 }
 0x48f   : > { %p579_p2 = pneg %p578_p1 }
 0x491   : > { %695 = dma.done.wait (%p579_p2), %s476_s9, 16  }
 0x492   : > { %697 = vsyncadd (%p579_p2), %s476_s9, 4294967280  ;;  %p13_p3 = scmp.ge.s32.totalorder %s771_s18, 4   ;;  %s916_s12 = smov %s704_s13 }
 0x493   : > { %s917_s13 = smov %s708_s14  ;;  %s918_s14 = smov %s782_s21 }
 0x494   : > { %s919_s15 = smov %s771_s18  ;;  %15 = sbr.rel (!%p13_p3) target bundleno = 3 (0x3), region = 86 }
 0x499   :  { %480 = vsyncpa [#allocation3], 1 }
 0x49a   :  { %482 = vsyncpa [#allocation3 + $0x1], 1 }

</bundles_post_ra>
